<compile_context>
chip_gen: v7x
topology: tpu7x:2x2x1
jax: 0.10.0
libtpu: 0.0.40
codegen_flags: <defaults>
</compile_context>

<pallas_src>
import functools
import math

import jax
import jax.numpy as jnp
from jax.experimental import pallas as pl
from jax.experimental.pallas import tpu as pltpu


def _round_up(x, m):
    return ((x + m - 1) // m) * m


def _pick_tile(dim, candidates):
    """Largest candidate that evenly divides `dim` (dim is a multiple of 128)."""
    for c in candidates:
        if dim % c == 0:
            return c
    return 128


def _dense_fc_kernel(x_ref, w_ref, b_ref, o_ref):
    """Grid = (M/tm, N/tn, K/tk), K innermost ("arbitrary").  The f32 output tile
    doubles as the reduction accumulator: the out BlockSpec returns the same (i, j)
    block for every k, so o_ref stays resident in VMEM across the K loop."""
    k = pl.program_id(2)

    @pl.when(k == 0)
    def _():
        o_ref[...] = jnp.zeros_like(o_ref)

    # MXU matmul with f32 accumulation; operands are bf16 (default) or f32.
    o_ref[...] += jnp.dot(x_ref[...], w_ref[...],
                          preferred_element_type=jnp.float32)

    @pl.when(k == pl.num_programs(2) - 1)
    def _():
        o_ref[...] += b_ref[...]          # bias added exactly once, in f32


def prepare_dense_fc_params(weights, mask, biases, compute_dtype=jnp.bfloat16):
    """One-time (amortized) parameter preparation.

    Folds the {0,1} prune mask into the weights, casts to the MXU compute dtype and
    zero-pads K/N up to multiples of 128 so the per-call forward never touches the
    weight matrix outside the Pallas kernel.  Re-run after any prune_* call.

    Returns (w_prepared [K_pad, N_pad] compute_dtype, b_prepared [1, N_pad] f32).
    """
    n_in, n_out = weights.shape
    K = _round_up(n_in, 128)
    N = _round_up(n_out, 128)
    w = (weights * mask).astype(compute_dtype)
    if (K, N) != (n_in, n_out):
        w = jnp.pad(w, ((0, K - n_in), (0, N - n_out)))
    b = biases.astype(jnp.float32).reshape(1, n_out)
    if N != n_out:
        b = jnp.pad(b, ((0, 0), (0, N - n_out)))
    return w, b


@functools.partial(jax.jit, static_argnames=("n_outputs", "activation"))
def dense_fc_forward(inputs, w_prepared, b_prepared, *, n_outputs, activation=None):
    """Pallas implementation of DenseFCLayer.forward(inputs, use_mask=True)."""
    B, n_in = inputs.shape
    K, N = w_prepared.shape
    assert n_in <= K and n_outputs <= N

    compute_dtype = w_prepared.dtype

    # ---- tile selection (all static) ----
    tm = min(512, _round_up(B, 8))              # single weight pass for batch <= 512
    M = _round_up(B, tm)
    tn = _pick_tile(N, (512, 384, 256, 128))
    tk = _pick_tile(K, (1024, 512, 384, 256, 128))

    # Guarantee >= 2 "parallel" grid blocks when the shape allows it, so both
    # TensorCores get work on v7x (neutral on single-TC v5e/v6e).
    if (M // tm) * (N // tn) < 2:
        if N // 128 >= 2:
            tn = max(c for c in (384, 256, 128) if N % c == 0 and N // c >= 2)
        elif _round_up(B, 8) >= 16:
            tm = _round_up((_round_up(B, 8) + 1) // 2, 8)
            M = _round_up(B, tm)

    # ---- per-call activation padding only (x is tiny vs. the weight stream) ----
    x = inputs.astype(compute_dtype)
    if (M, K) != (B, n_in):
        x = jnp.pad(x, ((0, M - B), (0, K - n_in)))   # zero rows/cols: no effect on K-sum

    grid = (M // tm, N // tn, K // tk)

    cost = pl.CostEstimate(
        flops=2 * M * N * K,
        transcendentals=0,
        bytes_accessed=(x.size * x.dtype.itemsize
                        + w_prepared.size * w_prepared.dtype.itemsize
                        + b_prepared.size * 4
                        + M * N * 4))

    out = pl.pallas_call(
        _dense_fc_kernel,
        out_shape=jax.ShapeDtypeStruct((M, N), jnp.float32),
        grid_spec=pltpu.PrefetchScalarGridSpec(
            num_scalar_prefetch=0,
            grid=grid,
            in_specs=[
                pl.BlockSpec((tm, tk), lambda i, j, k: (i, k)),   # x tile
                pl.BlockSpec((tk, tn), lambda i, j, k: (k, j)),   # masked-weight tile
                pl.BlockSpec((1, tn), lambda i, j, k: (0, j)),    # bias row
            ],
            out_specs=pl.BlockSpec((tm, tn), lambda i, j, k: (i, j)),
        ),
        compiler_params=pltpu.CompilerParams(
            dimension_semantics=("parallel", "parallel", "arbitrary")),
        cost_estimate=cost,
    )(x, w_prepared, b_prepared)

    out = out[:B, :n_outputs]
    if activation is not None:
        out = activation(out)
    return out


def init_dense_fc_params(key, n_inputs, n_outputs):
    """Deterministic param init mirroring DenseFCLayer.__init__:
       kaiming_uniform_ weights (fan_in = n_outputs for a [n_inputs, n_outputs]
       tensor per torch's _calculate_fan_in_and_fan_out), zero biases, ones mask."""
    fan_in = n_outputs
    gain = math.sqrt(2.0)                       # leaky_relu gain with a=0 (torch default)
    bound = gain * math.sqrt(3.0 / fan_in)
    weights = jax.random.uniform(key, (n_inputs, n_outputs),
                                 dtype=jnp.float32, minval=-bound, maxval=bound)
    mask = jnp.ones_like(weights)
    biases = jnp.zeros((n_outputs,), dtype=jnp.float32)
    return weights, mask, biases


if __name__ == "__main__":
    key = jax.random.PRNGKey(0)
    k_w, k_x, k_w2, k_x2 = jax.random.split(key, 4)

    # --- Test 1: exact-f32 path, pruned mask (~50% zeros), ragged shapes that
    #     exercise the 128-multiple padding and the parallel-block re-tiling. ---
    batch, n_inputs, n_outputs = 8, 50, 130
    weights, mask, biases = init_dense_fc_params(k_w, n_inputs, n_outputs)
    thr = jnp.median(jnp.abs(weights))
    mask = (jnp.abs(weights) >= thr).astype(jnp.float32)   # prune_by_threshold semantics
    x = jax.random.normal(k_x, (batch, n_inputs), dtype=jnp.float32)

    w_p, b_p = prepare_dense_fc_params(weights, mask, biases,
                                       compute_dtype=jnp.float32)
    out = dense_fc_forward(x, w_p, b_p, n_outputs=n_outputs)
    out = jax.block_until_ready(out)
    ref = x @ (weights * mask) + biases[None, :]
    assert out.shape == (batch, n_outputs)
    assert jnp.allclose(out, ref, atol=2e-3, rtol=2e-3), \
        float(jnp.max(jnp.abs(out - ref)))

    # --- Test 2: default bf16 compute, multi-step K reduction (grid K dim > 1),
    #     full mask, >=2 parallel blocks carved out of a 384-wide output. ---
    batch2, n_in2, n_out2 = 16, 2048, 384
    weights2, mask2, biases2 = init_dense_fc_params(k_w2, n_in2, n_out2)
    x2 = jax.random.normal(k_x2, (batch2, n_in2), dtype=jnp.float32)

    w_p2, b_p2 = prepare_dense_fc_params(weights2, mask2, biases2)   # bf16 default
    out2 = dense_fc_forward(x2, w_p2, b_p2, n_outputs=n_out2)
    out2 = jax.block_until_ready(out2)
    ref2 = x2 @ (weights2 * mask2) + biases2[None, :]
    assert out2.shape == (batch2, n_out2)
    assert jnp.allclose(out2, ref2, atol=5e-2, rtol=5e-2), \
        float(jnp.max(jnp.abs(out2 - ref2)))

    print("KERNEL_OK")
</pallas_src>

<mosaic_0001>
module attributes {stable_mosaic.version = 11 : i64} {
  func.func @_dense_fc_kernel(%arg0: i32, %arg1: i32, %arg2: i32, %arg3: memref<8x128xf32, #tpu.memory_space<vmem>>, %arg4: memref<128x128xf32, #tpu.memory_space<vmem>>, %arg5: memref<1x128xf32, #tpu.memory_space<vmem>>, %arg6: memref<8x128xf32, #tpu.memory_space<vmem>>) attributes {dimension_semantics = [#tpu.dimension_semantics<parallel>, #tpu.dimension_semantics<parallel>, #tpu.dimension_semantics<arbitrary>], iteration_bounds = array<i64: 1, 2, 1>, scalar_prefetch = 0 : i64, scratch_operands = 0 : i64, tpu.core_type = #tpu.core_type<tc>, window_params = [{transform_indices = @transform_0, window_bounds = array<i64: 8, 128>}, {transform_indices = @transform_1, window_bounds = array<i64: 128, 128>}, {transform_indices = @transform_2, window_bounds = array<i64: 1, 128>}, {transform_indices = @transform_3, window_bounds = array<i64: 8, 128>}]} {
    %c0_i32 = arith.constant 0 : i32
    %0 = arith.cmpi eq, %arg2, %c0_i32 : i32
    %1 = arith.extui %0 : i1 to i32
    %c0_i32_0 = arith.constant 0 : i32
    %2 = arith.cmpi ne, %1, %c0_i32_0 : i32
    scf.if %2 {
      %cst_10 = arith.constant 0.000000e+00 : f32
      %12 = vector.broadcast %cst_10 : f32 to vector<8x128xf32>
      %c0_11 = arith.constant 0 : index
      %c0_12 = arith.constant 0 : index
      %13 = vector.load %arg6[%c0_11, %c0_12] : memref<8x128xf32, #tpu.memory_space<vmem>>, vector<8x128xf32>
      tpu.vector_store %arg6[%c0_11, %c0_12], %12 {strides = array<i32>} : memref<8x128xf32, #tpu.memory_space<vmem>>, vector<8x128xf32>,
    } else {
    }
    %c0 = arith.constant 0 : index
    %c0_1 = arith.constant 0 : index
    %3 = vector.load %arg6[%c0, %c0_1] : memref<8x128xf32, #tpu.memory_space<vmem>>, vector<8x128xf32>
    %c0_2 = arith.constant 0 : index
    %c0_3 = arith.constant 0 : index
    %4 = vector.load %arg3[%c0_2, %c0_3] : memref<8x128xf32, #tpu.memory_space<vmem>>, vector<8x128xf32>
    %c0_4 = arith.constant 0 : index
    %c0_5 = arith.constant 0 : index
    %5 = vector.load %arg4[%c0_4, %c0_5] : memref<128x128xf32, #tpu.memory_space<vmem>>, vector<128x128xf32>
    %cst = arith.constant dense<0.000000e+00> : vector<8x128xf32>
    %6 = tpu.matmul %4, %5, %cst {dimension_numbers = #tpu.dot_dimension_numbers<[1], [0], [0], [1], [0, 0, 1, 1], [], []>} : vector<8x128xf32>, vector<128x128xf32>, vector<8x128xf32> -> vector<8x128xf32>
    %7 = arith.addf %3, %6 : vector<8x128xf32>
    %c0_6 = arith.constant 0 : index
    %c0_7 = arith.constant 0 : index
    %8 = vector.load %arg6[%c0_6, %c0_7] : memref<8x128xf32, #tpu.memory_space<vmem>>, vector<8x128xf32>
    tpu.vector_store %arg6[%c0_6, %c0_7], %7 {strides = array<i32>} : memref<8x128xf32, #tpu.memory_space<vmem>>, vector<8x128xf32>,
    %c0_i32_8 = arith.constant 0 : i32
    %9 = arith.cmpi eq, %arg2, %c0_i32_8 : i32
    %10 = arith.extui %9 : i1 to i32
    %c0_i32_9 = arith.constant 0 : i32
    %11 = arith.cmpi ne, %10, %c0_i32_9 : i32
    scf.if %11 {
      %c0_10 = arith.constant 0 : index
      %c0_11 = arith.constant 0 : index
      %12 = vector.load %arg6[%c0_10, %c0_11] : memref<8x128xf32, #tpu.memory_space<vmem>>, vector<8x128xf32>
      %c0_12 = arith.constant 0 : index
      %c0_13 = arith.constant 0 : index
      %13 = vector.load %arg5[%c0_12, %c0_13] : memref<1x128xf32, #tpu.memory_space<vmem>>, vector<1x128xf32>
      %14 = vector.broadcast %13 : vector<1x128xf32> to vector<8x128xf32>
      %15 = arith.addf %12, %14 : vector<8x128xf32>
      %c0_14 = arith.constant 0 : index
      %c0_15 = arith.constant 0 : index
      %16 = vector.load %arg6[%c0_14, %c0_15] : memref<8x128xf32, #tpu.memory_space<vmem>>, vector<8x128xf32>
      tpu.vector_store %arg6[%c0_14, %c0_15], %15 {strides = array<i32>} : memref<8x128xf32, #tpu.memory_space<vmem>>, vector<8x128xf32>,
    } else {
    }
    return
  }
  func.func @transform_0(%arg0: i32, %arg1: i32, %arg2: i32) -> (i32, i32) {
    %c0_i32 = arith.constant 0 : i32
    return %arg0, %arg2 : i32, i32
  }
  func.func @transform_1(%arg0: i32, %arg1: i32, %arg2: i32) -> (i32, i32) {
    %c0_i32 = arith.constant 0 : i32
    return %arg2, %arg1 : i32, i32
  }
  func.func @transform_2(%arg0: i32, %arg1: i32, %arg2: i32) -> (i32, i32) {
    %c0_i32 = arith.constant 0 : i32
    %c0_i32_0 = arith.constant 0 : i32
    return %c0_i32, %arg1 : i32, i32
  }
  func.func @transform_3(%arg0: i32, %arg1: i32, %arg2: i32) -> (i32, i32) {
    %c0_i32 = arith.constant 0 : i32
    return %arg0, %arg1 : i32, i32
  }
}

</mosaic_0001>

<bundles_post_ra>
// kernel: dense_fc_forward.1
= control target key start
LH: loop header
LB: loop body
LE: loop exit
PB: predicated region body
PF: predicated region fallthrough
CT: control target
= control target key end

     0   :  { %8 = vsyncpa [#allocation3], 0  ;;  %s992_s0 = inlined_call_operand.vmem [shape: f32[8,128], index: 0, kind: input, shape index: {}]   ;;  %s993_s1 = inlined_call_operand.hbm [shape: f32[128,256], index: 1, kind: input, shape index: {}]   ;;  %s994_s2 = inlined_call_operand.vmem [shape: f32[1,256], index: 2, kind: input, shape index: {}]   ;;  %s995_s3 = inlined_call_operand.hbm [shape: f32[8,256], index: 3, kind: output, shape index: {}]  }
   0x1   :  { %10 = vsyncpa [#allocation3 + $0x1], 0 }
   0x2   :  { %11 = vsyncpa [#allocation4], 0 }
   0x3   :  { %13 = vsyncpa [#allocation4 + $0x1], 0  ;;  %s794_s12 = smov 0   ;;  %s796_s13 = smov 0  }
   0x4   :  { %s798_s14 = smov 0   ;;  %s800_s15 = smov 0  }
   0x5   :  { %s802_s16 = smov 0   ;;  %s804_s17 = smov 0  }
   0x6 LB: > { %s493_s18 = sadd.s32 4294967295, %s764_s17   ;;  %s494_s19 = sadd.s32 4294967294, %s764_s17   ;;  %s764_s17 = sphi %s804_s17, %s19_s17   ;;  %s760_s16 = sphi %s802_s16, %s1009_s16   ;;  %s756_s15 = sphi %s800_s15, %s1008_s15   ;;  %s752_s14 = sphi %s798_s14, %s1007_s14   ;;  %s748_s13 = sphi %s796_s13, %s1006_s13   ;;  %s744_s12 = sphi %s794_s12, %s1005_s12  }
   0x7   : > { %s34_s20 = sadd.s32 1, %s760_s16  ;;  %s75_s21 = sadd.s32 1, %s752_s14 }
   0x8   : > { %p36_p0 = scmp.ge.s32.totalorder %s34_s20, 2  ;;  %p82_p1 = scmp.ne.s32.totalorder %s752_s14, %s748_s13 }
   0x9   : > { %p83_p2 = scmp.eq.s32.totalorder %s764_s17, 0  ;;  %p88_p3 = scmp.ne.s32.totalorder %s748_s13, %s744_s12 }
   0xa   : > { %s1011_s20 = smov (%p36_p0, %s34_s20), 0  ;;  %p89_p5 = scmp.eq.s32.totalorder %s493_s18, 0 }
   0xb   : > { %p835_p4 = por %p83_p2, %p82_p1  ;;  %s71_s23 = ssub.s32 %s760_s16, %s1011_s20 }
   0xc   : > { %p140_p6 = scmp.eq.s32.totalorder %s493_s18, 1  ;;  %p73_p7 = scmp.eq.s32.totalorder %s71_s23, 0 }
   0xd   : > { %p841_p8 = por %p89_p5, %p88_p3  ;;  %p146_p10 = scmp.eq.s32.totalorder %s494_s19, 1 }
   0xe   : > { %p845_p9 = por %p140_p6, %p82_p1  ;;  %p596_p13 = scmp.lt.s32.totalorder %s764_s17, 2 }
   0xf   : > { %s850_s26 = scalar_select %p73_p7, %s752_s14, %s75_s21  }
  0x10   : > { %s999_s25 = scalar_select %p845_p9, 1, 0 }
  0x11   : > { %p852_p11 = por %p146_p10, %p88_p3  ;;  %s176_s28 = sand.u32 1, %s752_s14  }
  0x12   : > { %s498_s29 = sshll.u32 %s176_s28, 7  ;;  %s499_s30 = sshll.u32 %s760_s16, 7 }
  0x13   : > { %s1000_s27 = scalar_select %p852_p11, 1, 0 }
  0x14   : > { %s863_s6 = scalar_lea.hbm %s993_s1, %s499_s30  ;;  %s180_s7 = scalar_lea.vmem [#allocation2], %s498_s29 }
  0x15   : > { %s189_s8 = sshll.u32 %s180_s7, 4  ;;  %p869_p0 = pnand %p596_p13, %p835_p4  ;;  %s865_s8 = int_to_ptr.vmem [resolvable:$true] %s189_s8 }
  0x16   : > { %s873_s10 = scalar_lea.sflag [#allocation3], %s176_s28  ;;  %s652_s11 = scalar_lea.hbm %s863_s6, 2048 }
  0x17   : > { %p653_p1 = scmp.ne.s32.totalorder %s863_s6, %s652_s11  ;;  %p654_p2 = pneg %p869_p0 }
  0x18   : > { %s657_s21 = scalar_lea.hbm %s993_s1, 4096  ;;  %p658_p4 = scmp.lt.u32.totalorder %s863_s6, %s993_s1 }
  0x19   : > { %p655_p3 = pnand %p654_p2, %p653_p1  ;;  %p659_p6 = scmp.lt.u32.totalorder %s657_s21, %s652_s11 }
  0x1a   : > { %p661_p10 = scmp.lt.u32.totalorder %s652_s11, %s863_s6 }
  0x1b   : > { %p656_p5 = pneg %p655_p3  ;;  %p660_p7 = por %p659_p6, %p658_p4 }
  0x1d   : > { %p662_p13 = por %p661_p10, %p660_p7 }
  0x1f   : > { %p663_p12 = pnand %p662_p13, %p656_p5 }
  0x21   : > { %666 = shalt.err (!%p663_p12)
}
  0x22   : > { %s667_s28 = scalar_lea.vmem %s865_s8, 2048  ;;  %s766_s29 = smov [#allocation2]  }
  0x23   : > { %p668_p1 = scmp.ne.s32.totalorder %s865_s8, %s667_s28  ;;  %s672_s30 = sshll.u32 %s766_s29, 4  ;;  %s673_s30 = int_to_ptr.vmem [resolvable:$false] %s672_s30 }
  0x24   : > { %s674_s4 = scalar_lea.vmem %s673_s30, 4096  ;;  %p675_p9 = scmp.lt.s32.totalorder %s865_s8, %s673_s30 }
  0x25   : > { %p670_p3 = pnand %p668_p1, %p654_p2  ;;  %p676_p4 = scmp.lt.s32.totalorder %s674_s4, %s667_s28 }
  0x27   : > { %p671_p11 = pneg %p670_p3  ;;  %p677_p6 = por %p676_p4, %p675_p9 }
  0x29   : > { %p678_p7 = pnand %p677_p6, %p671_p11 }
  0x2b   : > { %681 = shalt.err (!%p678_p7)
}
  0x2c   : > { %s767_s5 = smov 256   ;;  %s768_s7 = smov 128  }
  0x2d   : > { %s769_s11 = smov 8   ;;  %p500_p12 = scmp.ge.s32.totalorder %s764_s17, 1 }
  0x2e   : > { %591 = dma.hbm_to_vmem [thread:$0]  (!%p869_p0), %s863_s6, 2048, %s865_s8, %s873_s10, %s767_s5, %s768_s7, %s769_s11  }
  0x2f   : > { %p203_p2 = scmp.lt.s32.totalorder %s764_s17, 3 }
  0x31   : > { %p204_p5 = pnand %p500_p12, %p203_p2 }
  0x32   : > { %s904_s18 = sand.u32 (!%p204_p5), 1, %s748_s13  }
  0x33   : > { %207 = sbr.rel (%p204_p5) target bundleno = 321 (0x141), region = 32  ;;  %s501_s19 = sshll.u32 (!%p204_p5), %s904_s18, 7 }
  0x34   : > { %s210_s21 = scalar_lea.sflag (!%p204_p5), [#allocation3], %s904_s18  ;;  %s908_s22 = scalar_lea.vmem (!%p204_p5), [#allocation2], %s501_s19 }
  0x3a   : > { %735 = dma.done.wait (%p841_p8), %s210_s21, 2048  }
  0x3b   : > { %737 = vsyncadd (%p841_p8), %s210_s21, 4294965248  ;;  %v770_v0 = vmov 0.0|0.0   ;;  %vm771_vm0 = vmmov 0   ;;  %v772_v1 = vmov 0.0   ;;  %v264_v2 = vld [vmem:[%s908_s22] sm:$0xff]  ;;  %v265_v3 = vld [vmem:[%s908_s22 + $0x8] sm:$0xff] }
  0x3c   : > { %560 = vmatprep.subr.bf16.mxu0 %v770_v0  ;;  %557 = vmatprep.mubr.msk.f32.mxu0 %vm771_vm0, %v772_v1  ;;  %v266_v4 = vld [vmem:[%s908_s22 + $0x10] sm:$0xff]  ;;  %v561_v5 = vpack.c.bf16 %v265_v3, %v264_v2  ;;  %v267_v6 = vld [vmem:[%s908_s22 + $0x18] sm:$0xff]  ;;  %v268_v8 = vld [vmem:[%s908_s22 + $0x20] sm:$0xff]  ;;  %p254_p8 = scmp.lt.s32.totalorder %s756_s15, 1  ;;  %s502_s9 = sshll.u32 %s904_s18, 3 }
  0x3d   : > { %v564_v7 = vpack.c.bf16 %v267_v6, %v266_v4  ;;  %v269_v9 = vld [vmem:[%s908_s22 + $0x28] sm:$0xff]  ;;  %v270_v11 = vld [vmem:[%s908_s22 + $0x30] sm:$0xff]  ;;  %v271_v12 = vld [vmem:[%s908_s22 + $0x38] sm:$0xff]  ;;  %s505_s29 = sshll.u32 %s756_s15, 7  ;;  %s245_s30 = scalar_lea.vmem [#allocation5], %s502_s9 }
  0x3e   : > { %562 = vmatpush3.bf16.msra.mxu0 %v561_v5  ;;  %v567_v10 = vpack.c.bf16 %v269_v9, %v268_v8  ;;  %v570_v13 = vpack.c.bf16 %v271_v12, %v270_v11  ;;  %v272_v14 = vld [vmem:[%s908_s22 + $0x40] sm:$0xff]  ;;  %v273_v15 = vld [vmem:[%s908_s22 + $0x48] sm:$0xff]  ;;  %v274_v17 = vld [vmem:[%s908_s22 + $0x50] sm:$0xff]  ;;  %s255_s8 = scalar_select %p254_p8, %s756_s15, 1 }
  0x3f   : > { %563 = vmatprep.subr.bf16.mxu0 %v770_v0  ;;  %v573_v16 = vpack.c.bf16 %v273_v15, %v272_v14  ;;  %v275_v18 = vld [vmem:[%s908_s22 + $0x58] sm:$0xff]  ;;  %v276_v20 = vld [vmem:[%s908_s22 + $0x60] sm:$0xff]  ;;  %v277_v21 = vld [vmem:[%s908_s22 + $0x68] sm:$0xff]  ;;  %s381_s4 = sshll.u32 %s245_s30, 4  ;;  %s943_s11 = scalar_lea.hbm %s995_s3, %s505_s29  ;;  %s945_s4 = int_to_ptr.vmem [resolvable:$true] %s381_s4 }
  0x40   : > { %v576_v19 = vpack.c.bf16 %v275_v18, %v274_v17  ;;  %v579_v22 = vpack.c.bf16 %v277_v21, %v276_v20  ;;  %v278_v23 = vld [vmem:[%s908_s22 + $0x70] sm:$0xff]  ;;  %v279_v24 = vld [vmem:[%s908_s22 + $0x78] sm:$0xff]  ;;  %s256_s28 = scalar_lea.vmem %s994_s2, %s255_s8  ;;  %s366_s19 = scalar_lea.sflag [#allocation4], %s904_s18 }
  0x41   : > { %v582_v25 = vpack.c.bf16 %v279_v24, %v278_v23  ;;  %v263_v26 = vld [vmem:[%s992_s0] sm:$0xff]  ;;  %s682_s21 = scalar_lea.vmem %s945_s4, 128  ;;  %p1002_p11 = scmp.ne.s32.totalorder %s999_s25, 0 }
  0x42   : > { %565 = vmatpush3.bf16.msra.mxu0 %v564_v7  ;;  %v503_v28 = vld [vmem:[%s256_s28] ss:$0 sm:$0xff]  ;;  %p683_p9 = scmp.ne.s32.totalorder %s945_s4, %s682_s21  ;;  %s773_s15 = smov [#allocation5]  }
  0x43   : > { %566 = vmatprep.subr.bf16.mxu0 %v770_v0  ;;  %s686_s22 = sshll.u32 %s773_s15, 4  ;;  %s687_s22 = int_to_ptr.vmem [resolvable:$false] %s686_s22 }
  0x44   : > { %p684_p0 = pnand %p683_p9, %p1002_p11  ;;  %s688_s24 = scalar_lea.vmem %s687_s22, 256 }
  0x45   : > { %p689_p13 = scmp.lt.s32.totalorder %s945_s4, %s687_s22  ;;  %p690_p1 = scmp.lt.s32.totalorder %s688_s24, %s682_s21 }
  0x46   : > { %568 = vmatpush3.bf16.msra.mxu0 %v567_v10  ;;  %p685_p10 = pneg %p684_p0 }
  0x47   : > { %569 = vmatprep.subr.bf16.mxu0 %v770_v0  ;;  %p691_p3 = por %p690_p1, %p689_p13 }
  0x49   : > { %p692_p4 = pnand %p691_p3, %p685_p10 }
  0x4a   : > { %571 = vmatpush3.bf16.msra.mxu0 %v570_v13 }
  0x4b   : > { %572 = vmatprep.subr.bf16.mxu0 %v770_v0 }
  0x4e   : > { %574 = vmatpush3.bf16.msra.mxu0 %v573_v16 }
  0x4f   : > { %575 = vmatprep.subr.bf16.mxu0 %v770_v0 }
  0x52   : > { %577 = vmatpush3.bf16.msra.mxu0 %v576_v19 }
  0x53   : > { %578 = vmatprep.subr.bf16.mxu0 %v770_v0 }
  0x56   : > { %580 = vmatpush3.bf16.msra.mxu0 %v579_v22 }
  0x57   : > { %581 = vmatprep.subr.bf16.mxu0 %v770_v0 }
  0x5a   : > { %583 = vmatpush3.bf16.msra.mxu0 %v582_v25 }
  0x5d   : > { %558 = vmatmul.mubr.f32.vlgmr.msra.gmra.mrb[0].mxu0 %v263_v26 }
 0x130   : > { %v346_v27 = vpop.f32.mrb[0].mxu0 }
 0x131   : > { %v559_v29 = vpop.f32.mrb[1].mxu0  ;;  %v363_v30 = vadd.f32 %v503_v28, %v346_v27 }
 0x133   : > { %364 = vst [vmem:[%s245_s30] sm:$0xff] %v363_v30 }
 0x134   : > { %695 = shalt.err (!%p692_p4)
}
 0x135   : > { %s696_s18 = scalar_lea.hbm %s943_s11, 128  ;;  %s700_s9 = scalar_lea.hbm %s995_s3, 256 }
 0x136   : > { %p697_p6 = scmp.ne.s32.totalorder %s943_s11, %s696_s18  ;;  %p701_p2 = scmp.lt.u32.totalorder %s943_s11, %s995_s3 }
 0x137   : > { %p702_p5 = scmp.lt.u32.totalorder %s700_s9, %s696_s18  ;;  %p704_p9 = scmp.lt.u32.totalorder %s696_s18, %s943_s11 }
 0x138   : > { %p698_p7 = pnand %p697_p6, %p1002_p11 }
 0x139   : > { %p703_p8 = por %p702_p5, %p701_p2 }
 0x13a   : > { %p699_p12 = pneg %p698_p7 }
 0x13b   : > { %p705_p0 = por %p704_p9, %p703_p8 }
 0x13d   : > { %p706_p10 = pnand %p705_p0, %p699_p12 }
 0x13f   : > { %709 = shalt.err (!%p706_p10)
}
 0x140   : > { %586 = dma.vmem_to_hbm [thread:$0]  (%p1002_p11), %s945_s4, 128, %s943_s11, %s366_s19  }
 0x141 PF: > { %s393_s28 = sand.u32 1, %s744_s12   ;;  %p1003_p13 = scmp.ne.s32.totalorder %s1000_s27, 0 }
 0x142   : > { %p1004_p1 = scmp.ge.s32.totalorder %s764_s17, 2  ;;  %s394_s29 = scalar_lea.sflag [#allocation4], %s393_s28 }
 0x144   : > { %p593_p3 = pnand %p1004_p1, %p1003_p13 }
 0x146   : > { %739 = dma.done.wait (!%p593_p3), %s394_s29, 128  }
 0x147   : > { %741 = vsyncadd (!%p593_p3), %s394_s29, 4294967168  ;;  %s19_s17 = sadd.s32 1, %s764_s17   ;;  %s1005_s12 = smov %s748_s13 }
 0x148   : > { %p16_p4 = scmp.ge.s32.totalorder %s19_s17, 4   ;;  %s1006_s13 = smov %s752_s14 }
 0x149   : > { %s1007_s14 = smov %s850_s26  ;;  %s1008_s15 = smov %s760_s16 }
 0x14a   : > { %s1009_s16 = smov %s1011_s20  ;;  %18 = sbr.rel (!%p16_p4) target bundleno = 6 (0x6), region = 91 }
 0x151   :  { %399 = vsyncpa [#allocation3], 1 }
 0x152   :  { %401 = vsyncpa [#allocation3 + $0x1], 1 }
 0x153   :  { %402 = vsyncpa [#allocation4], 1 }
 0x154   :  { %404 = vsyncpa [#allocation4 + $0x1], 1 }

</bundles_post_ra>
